<compile_context>
chip_gen: v7x
topology: tpu7x:2x2x1
jax: 0.10.0
libtpu: 0.0.40
codegen_flags: <defaults>
</compile_context>

<pallas_src>
import functools

import jax
import jax.numpy as jnp
from jax.experimental import pallas as pl
from jax.experimental.pallas import tpu as pltpu

INPUT_SIZE = 259
HIDDEN_SIZE = 128
OUTPUT_SIZE = 2
BN_EPS = 1e-5
DEFAULT_BLOCK_BATCH = 2048  # rows per grid step for large batches (multiple of 128)


def _bc_kernel(x_ref,
               w1_ref, b1_ref,
               w2_ref, b2_ref,
               w3_ref, b3_ref,
               w4t_ref, b4t_ref,
               o_ref):
    """Forward for one (tb, 259) batch tile. BN is pre-folded into w2/w3/w4t & biases."""
    x = x_ref[...].astype(jnp.bfloat16)  # cast in-kernel (free on VPU), (tb, 259)

    # Layer 1: Linear(259->128) + ReLU   (BN1 folded into w2/b2; Dropout = id at eval)
    h = jnp.dot(x, w1_ref[...], preferred_element_type=jnp.float32) + b1_ref[...]
    h = jnp.maximum(h, 0.0)

    # Layer 2: Linear(128->128) + ReLU   (BN2 folded into w3/b3; Dropout = id at eval)
    h = jnp.dot(h.astype(jnp.bfloat16), w2_ref[...],
                preferred_element_type=jnp.float32) + b2_ref[...]
    h = jnp.maximum(h, 0.0)

    # Layer 3: Linear(128->64) + ReLU    (BN3 folded into w4t/b4t)
    h = jnp.dot(h.astype(jnp.bfloat16), w3_ref[...],
                preferred_element_type=jnp.float32) + b3_ref[...]
    h = jnp.maximum(h, 0.0)

    # Layer 4: Linear(64->2) + Tanh, computed transposed for a lane-dense store:
    # (2, 64) . (tb, 64)^T -> (2, tb)
    out_t = jax.lax.dot_general(
        w4t_ref[...], h.astype(jnp.bfloat16),
        dimension_numbers=(((1,), (1,)), ((), ())),
        preferred_element_type=jnp.float32)
    o_ref[...] = jnp.tanh(out_t + b4t_ref[...]).astype(o_ref.dtype)


def _resident_spec(shape):
    # Full-array block, constant index map -> stays in VMEM across all grid steps.
    return pl.BlockSpec(shape, lambda i: (0, 0))


def _round_up(a, b):
    return ((a + b - 1) // b) * b


@functools.partial(jax.jit, static_argnames=("block_batch",))
def bc_forward(x, params, *, block_batch=DEFAULT_BLOCK_BATCH):
    """x: (batch, 259) float (any float dtype). params: folded dict from init_params()[0]."""
    batch = x.shape[0]

    if batch <= 128:
        # Single tile; block shape equals the full array dims (exempt from (8,128) rule).
        tb = batch
    else:
        # Multiple of 128 (lane axis of the transposed output / sublane-aligned x rows),
        # and at least 2 grid steps so both v7x TensorCores get batch tiles.
        tb = min(block_batch, _round_up(pl.cdiv(batch, 2), 128))

    grid = (pl.cdiv(batch, tb),)

    out_t = pl.pallas_call(
        _bc_kernel,
        out_shape=jax.ShapeDtypeStruct((OUTPUT_SIZE, batch), jnp.float32),
        grid=grid,
        in_specs=[
            pl.BlockSpec((tb, INPUT_SIZE), lambda i: (i, 0)),   # x: batch-tiled stream
            _resident_spec(params["w1"].shape), _resident_spec(params["b1"].shape),
            _resident_spec(params["w2"].shape), _resident_spec(params["b2"].shape),
            _resident_spec(params["w3"].shape), _resident_spec(params["b3"].shape),
            _resident_spec(params["w4t"].shape), _resident_spec(params["b4t"].shape),
        ],
        # Lane-dense transposed output: (2, tb) block, tiled along the lane axis.
        out_specs=pl.BlockSpec((OUTPUT_SIZE, tb), lambda i: (0, i)),
        compiler_params=pltpu.CompilerParams(
            dimension_semantics=("parallel",),      # shard batch tiles across TCs
            vmem_limit_bytes=32 * 1024 * 1024,      # ample headroom for tb=2048 tiles
        ),
    )(x,
      params["w1"], params["b1"],
      params["w2"], params["b2"],
      params["w3"], params["b3"],
      params["w4t"], params["b4t"])
    return out_t.T  # (batch, 2); tiny transpose in the wrapper


# ------------------------- parameter construction -------------------------

def _linear_init(key, fan_in, fan_out):
    # PyTorch nn.Linear default: U(-1/sqrt(fan_in), 1/sqrt(fan_in)) for W and b.
    kw, kb = jax.random.split(key)
    bound = 1.0 / jnp.sqrt(jnp.float32(fan_in))
    w = jax.random.uniform(kw, (fan_in, fan_out), jnp.float32, -bound, bound)
    b = jax.random.uniform(kb, (1, fan_out), jnp.float32, -bound, bound)
    return w, b


def _bn_fold(key, num_features):
    # Non-trivial BatchNorm params + running stats, folded to eval-mode scale/shift.
    kg, kb, km, kv = jax.random.split(key, 4)
    gamma = 1.0 + 0.1 * jax.random.normal(kg, (1, num_features), jnp.float32)
    beta = 0.1 * jax.random.normal(kb, (1, num_features), jnp.float32)
    running_mean = 0.1 * jax.random.normal(km, (1, num_features), jnp.float32)
    running_var = 1.0 + 0.1 * jax.random.uniform(kv, (1, num_features), jnp.float32)
    scale = gamma / jnp.sqrt(running_var + BN_EPS)
    shift = beta - running_mean * scale
    return scale, shift


def _fold_bn_into_next_linear(scale, shift, w, b):
    # (h*scale + shift) @ w + b  ==  h @ (scale^T * w) + (shift @ w + b)
    w_f = w * scale.reshape(-1, 1)
    b_f = shift @ w + b
    return w_f, b_f


def init_params(key):
    """Returns (folded_kernel_params, raw_reference_params)."""
    keys = jax.random.split(key, 7)
    w1, b1 = _linear_init(keys[0], INPUT_SIZE, HIDDEN_SIZE)
    s1, t1 = _bn_fold(keys[1], HIDDEN_SIZE)
    w2, b2 = _linear_init(keys[2], HIDDEN_SIZE, HIDDEN_SIZE)
    s2, t2 = _bn_fold(keys[3], HIDDEN_SIZE)
    w3, b3 = _linear_init(keys[4], HIDDEN_SIZE, HIDDEN_SIZE // 2)
    s3, t3 = _bn_fold(keys[5], HIDDEN_SIZE // 2)
    w4, b4 = _linear_init(keys[6], HIDDEN_SIZE // 2, OUTPUT_SIZE)

    raw = dict(w1=w1, b1=b1, s1=s1, t1=t1,
               w2=w2, b2=b2, s2=s2, t2=t2,
               w3=w3, b3=b3, s3=s3, t3=t3,
               w4=w4, b4=b4)

    # Fold each BN affine into the following Linear (exact at eval time).
    w2f, b2f = _fold_bn_into_next_linear(s1, t1, w2, b2)
    w3f, b3f = _fold_bn_into_next_linear(s2, t2, w3, b3)
    w4f, b4f = _fold_bn_into_next_linear(s3, t3, w4, b4)

    folded = dict(
        w1=w1.astype(jnp.bfloat16), b1=b1,
        w2=w2f.astype(jnp.bfloat16), b2=b2f,
        w3=w3f.astype(jnp.bfloat16), b3=b3f,
        # Last layer stored transposed so the kernel can emit a lane-dense (2, tb) block.
        w4t=jnp.transpose(w4f).astype(jnp.bfloat16),   # (2, 64)
        b4t=jnp.transpose(b4f),                        # (2, 1)
    )
    return folded, raw


def bc_forward_ref(x, p):
    """Pure-JAX f32 reference of the original eval-mode forward (unfolded)."""
    h = jnp.maximum(x @ p["w1"] + p["b1"], 0.0) * p["s1"] + p["t1"]
    h = jnp.maximum(h @ p["w2"] + p["b2"], 0.0) * p["s2"] + p["t2"]
    h = jnp.maximum(h @ p["w3"] + p["b3"], 0.0) * p["s3"] + p["t3"]
    return jnp.tanh(h @ p["w4"] + p["b4"])


if __name__ == "__main__":
    key = jax.random.PRNGKey(0)
    k_params, k_x1, k_x2 = jax.random.split(key, 3)
    params, raw = init_params(k_params)

    # Small single-tile batch.
    batch1 = 16
    x1 = jax.random.normal(k_x1, (batch1, INPUT_SIZE), jnp.float32)
    out1 = jax.block_until_ready(bc_forward(x1, params))
    ref1 = bc_forward_ref(x1, raw)
    assert out1.shape == (batch1, OUTPUT_SIZE)
    assert jnp.allclose(out1, ref1, atol=4e-2, rtol=4e-2), float(
        jnp.max(jnp.abs(out1 - ref1)))

    # Multi-tile batch with a ragged last tile (exercises cdiv grid + masked writeback).
    batch2 = 200
    x2 = jax.random.normal(k_x2, (batch2, INPUT_SIZE), jnp.float32)
    out2 = jax.block_until_ready(bc_forward(x2, params))
    ref2 = bc_forward_ref(x2, raw)
    assert out2.shape == (batch2, OUTPUT_SIZE)
    assert jnp.allclose(out2, ref2, atol=4e-2, rtol=4e-2), float(
        jnp.max(jnp.abs(out2 - ref2)))

    # TODO(synk): Dropout (p=0.3) masking and training-mode BatchNorm batch statistics
    # are intentionally not modeled; this kernel implements the eval-mode forward.
    print("KERNEL_OK")
</pallas_src>

<mosaic_0001>
module attributes {stable_mosaic.version = 11 : i64} {
  func.func @_bc_kernel(%arg0: i32, %arg1: memref<16x259xf32, #tpu.memory_space<vmem>>, %arg2: memref<259x128xbf16, #tpu.memory_space<vmem>>, %arg3: memref<1x128xf32, #tpu.memory_space<vmem>>, %arg4: memref<128x128xbf16, #tpu.memory_space<vmem>>, %arg5: memref<1x128xf32, #tpu.memory_space<vmem>>, %arg6: memref<128x64xbf16, #tpu.memory_space<vmem>>, %arg7: memref<1x64xf32, #tpu.memory_space<vmem>>, %arg8: memref<2x64xbf16, #tpu.memory_space<vmem>>, %arg9: memref<2x1xf32, #tpu.memory_space<vmem>>, %arg10: memref<2x16xf32, #tpu.memory_space<vmem>>) attributes {dimension_semantics = [#tpu.dimension_semantics<parallel>], iteration_bounds = array<i64: 1>, scalar_prefetch = 0 : i64, scratch_operands = 0 : i64, tpu.core_type = #tpu.core_type<tc>, window_params = [{transform_indices = @transform_0, window_bounds = array<i64: 16, 259>}, {pipeline_mode = #tpu.pipeline_mode<synchronous>, transform_indices = @transform_1, window_bounds = array<i64: 259, 128>}, {pipeline_mode = #tpu.pipeline_mode<synchronous>, transform_indices = @transform_2, window_bounds = array<i64: 1, 128>}, {pipeline_mode = #tpu.pipeline_mode<synchronous>, transform_indices = @transform_3, window_bounds = array<i64: 128, 128>}, {pipeline_mode = #tpu.pipeline_mode<synchronous>, transform_indices = @transform_4, window_bounds = array<i64: 1, 128>}, {pipeline_mode = #tpu.pipeline_mode<synchronous>, transform_indices = @transform_5, window_bounds = array<i64: 128, 64>}, {pipeline_mode = #tpu.pipeline_mode<synchronous>, transform_indices = @transform_6, window_bounds = array<i64: 1, 64>}, {pipeline_mode = #tpu.pipeline_mode<synchronous>, transform_indices = @transform_7, window_bounds = array<i64: 2, 64>}, {pipeline_mode = #tpu.pipeline_mode<synchronous>, transform_indices = @transform_8, window_bounds = array<i64: 2, 1>}, {transform_indices = @transform_9, window_bounds = array<i64: 2, 16>}]} {
    %c0 = arith.constant 0 : index
    %c0_0 = arith.constant 0 : index
    %0 = vector.load %arg1[%c0, %c0_0] : memref<16x259xf32, #tpu.memory_space<vmem>>, vector<16x259xf32>
    %1 = arith.truncf %0 : vector<16x259xf32> to vector<16x259xbf16>
    %c0_1 = arith.constant 0 : index
    %c0_2 = arith.constant 0 : index
    %2 = vector.load %arg2[%c0_1, %c0_2] : memref<259x128xbf16, #tpu.memory_space<vmem>>, vector<259x128xbf16>
    %cst = arith.constant dense<0.000000e+00> : vector<16x128xf32>
    %3 = tpu.matmul %1, %2, %cst {dimension_numbers = #tpu.dot_dimension_numbers<[1], [0], [0], [1], [0, 0, 1, 1], [], []>} : vector<16x259xbf16>, vector<259x128xbf16>, vector<16x128xf32> -> vector<16x128xf32>
    %c0_3 = arith.constant 0 : index
    %c0_4 = arith.constant 0 : index
    %4 = vector.load %arg3[%c0_3, %c0_4] : memref<1x128xf32, #tpu.memory_space<vmem>>, vector<1x128xf32>
    %5 = vector.broadcast %4 : vector<1x128xf32> to vector<16x128xf32>
    %6 = arith.addf %3, %5 : vector<16x128xf32>
    %cst_5 = arith.constant 0.000000e+00 : f32
    %7 = vector.broadcast %cst_5 : f32 to vector<16x128xf32>
    %8 = arith.maximumf %6, %7 : vector<16x128xf32>
    %9 = arith.truncf %8 : vector<16x128xf32> to vector<16x128xbf16>
    %c0_6 = arith.constant 0 : index
    %c0_7 = arith.constant 0 : index
    %10 = vector.load %arg4[%c0_6, %c0_7] : memref<128x128xbf16, #tpu.memory_space<vmem>>, vector<128x128xbf16>
    %cst_8 = arith.constant dense<0.000000e+00> : vector<16x128xf32>
    %11 = tpu.matmul %9, %10, %cst_8 {dimension_numbers = #tpu.dot_dimension_numbers<[1], [0], [0], [1], [0, 0, 1, 1], [], []>} : vector<16x128xbf16>, vector<128x128xbf16>, vector<16x128xf32> -> vector<16x128xf32>
    %c0_9 = arith.constant 0 : index
    %c0_10 = arith.constant 0 : index
    %12 = vector.load %arg5[%c0_9, %c0_10] : memref<1x128xf32, #tpu.memory_space<vmem>>, vector<1x128xf32>
    %13 = vector.broadcast %12 : vector<1x128xf32> to vector<16x128xf32>
    %14 = arith.addf %11, %13 : vector<16x128xf32>
    %cst_11 = arith.constant 0.000000e+00 : f32
    %15 = vector.broadcast %cst_11 : f32 to vector<16x128xf32>
    %16 = arith.maximumf %14, %15 : vector<16x128xf32>
    %17 = arith.truncf %16 : vector<16x128xf32> to vector<16x128xbf16>
    %c0_12 = arith.constant 0 : index
    %c0_13 = arith.constant 0 : index
    %18 = vector.load %arg6[%c0_12, %c0_13] : memref<128x64xbf16, #tpu.memory_space<vmem>>, vector<128x64xbf16>
    %cst_14 = arith.constant dense<0.000000e+00> : vector<16x64xf32>
    %19 = tpu.matmul %17, %18, %cst_14 {dimension_numbers = #tpu.dot_dimension_numbers<[1], [0], [0], [1], [0, 0, 1, 1], [], []>} : vector<16x128xbf16>, vector<128x64xbf16>, vector<16x64xf32> -> vector<16x64xf32>
    %c0_15 = arith.constant 0 : index
    %c0_16 = arith.constant 0 : index
    %20 = vector.load %arg7[%c0_15, %c0_16] : memref<1x64xf32, #tpu.memory_space<vmem>>, vector<1x64xf32>
    %21 = vector.broadcast %20 : vector<1x64xf32> to vector<16x64xf32>
    %22 = arith.addf %19, %21 : vector<16x64xf32>
    %cst_17 = arith.constant 0.000000e+00 : f32
    %23 = vector.broadcast %cst_17 : f32 to vector<16x64xf32>
    %24 = arith.maximumf %22, %23 : vector<16x64xf32>
    %c0_18 = arith.constant 0 : index
    %c0_19 = arith.constant 0 : index
    %25 = vector.load %arg8[%c0_18, %c0_19] : memref<2x64xbf16, #tpu.memory_space<vmem>>, vector<2x64xbf16>
    %26 = arith.truncf %24 : vector<16x64xf32> to vector<16x64xbf16>
    %cst_20 = arith.constant dense<0.000000e+00> : vector<2x16xf32>
    %27 = tpu.matmul %25, %26, %cst_20 {dimension_numbers = #tpu.dot_dimension_numbers<[1], [1], [0], [0], [0, 0, 1, 0], [], []>} : vector<2x64xbf16>, vector<16x64xbf16>, vector<2x16xf32> -> vector<2x16xf32>
    %c0_21 = arith.constant 0 : index
    %c0_22 = arith.constant 0 : index
    %28 = vector.load %arg9[%c0_21, %c0_22] : memref<2x1xf32, #tpu.memory_space<vmem>>, vector<2x1xf32>
    %29 = vector.broadcast %28 : vector<2x1xf32> to vector<2x16xf32>
    %30 = arith.addf %27, %29 : vector<2x16xf32>
    %31 = math.tanh %30 : vector<2x16xf32>
    %c0_23 = arith.constant 0 : index
    %c0_24 = arith.constant 0 : index
    %32 = vector.load %arg10[%c0_23, %c0_24] : memref<2x16xf32, #tpu.memory_space<vmem>>, vector<2x16xf32>
    tpu.vector_store %arg10[%c0_23, %c0_24], %31 {strides = array<i32>} : memref<2x16xf32, #tpu.memory_space<vmem>>, vector<2x16xf32>,
    return
  }
  func.func @transform_0(%arg0: i32) -> (i32, i32) {
    %c0_i32 = arith.constant 0 : i32
    %c0_i32_0 = arith.constant 0 : i32
    return %arg0, %c0_i32 : i32, i32
  }
  func.func @transform_1(%arg0: i32) -> (i32, i32) {
    %c0_i32 = arith.constant 0 : i32
    %c0_i32_0 = arith.constant 0 : i32
    %c0_i32_1 = arith.constant 0 : i32
    return %c0_i32, %c0_i32_0 : i32, i32
  }
  func.func @transform_2(%arg0: i32) -> (i32, i32) {
    %c0_i32 = arith.constant 0 : i32
    %c0_i32_0 = arith.constant 0 : i32
    %c0_i32_1 = arith.constant 0 : i32
    return %c0_i32, %c0_i32_0 : i32, i32
  }
  func.func @transform_3(%arg0: i32) -> (i32, i32) {
    %c0_i32 = arith.constant 0 : i32
    %c0_i32_0 = arith.constant 0 : i32
    %c0_i32_1 = arith.constant 0 : i32
    return %c0_i32, %c0_i32_0 : i32, i32
  }
  func.func @transform_4(%arg0: i32) -> (i32, i32) {
    %c0_i32 = arith.constant 0 : i32
    %c0_i32_0 = arith.constant 0 : i32
    %c0_i32_1 = arith.constant 0 : i32
    return %c0_i32, %c0_i32_0 : i32, i32
  }
  func.func @transform_5(%arg0: i32) -> (i32, i32) {
    %c0_i32 = arith.constant 0 : i32
    %c0_i32_0 = arith.constant 0 : i32
    %c0_i32_1 = arith.constant 0 : i32
    return %c0_i32, %c0_i32_0 : i32, i32
  }
  func.func @transform_6(%arg0: i32) -> (i32, i32) {
    %c0_i32 = arith.constant 0 : i32
    %c0_i32_0 = arith.constant 0 : i32
    %c0_i32_1 = arith.constant 0 : i32
    return %c0_i32, %c0_i32_0 : i32, i32
  }
  func.func @transform_7(%arg0: i32) -> (i32, i32) {
    %c0_i32 = arith.constant 0 : i32
    %c0_i32_0 = arith.constant 0 : i32
    %c0_i32_1 = arith.constant 0 : i32
    return %c0_i32, %c0_i32_0 : i32, i32
  }
  func.func @transform_8(%arg0: i32) -> (i32, i32) {
    %c0_i32 = arith.constant 0 : i32
    %c0_i32_0 = arith.constant 0 : i32
    %c0_i32_1 = arith.constant 0 : i32
    return %c0_i32, %c0_i32_0 : i32, i32
  }
  func.func @transform_9(%arg0: i32) -> (i32, i32) {
    %c0_i32 = arith.constant 0 : i32
    %c0_i32_0 = arith.constant 0 : i32
    return %c0_i32, %arg0 : i32, i32
  }
}

</mosaic_0001>

<bundles_post_ra>
// kernel: bc_forward.1
= control target key start
LH: loop header
LB: loop body
LE: loop exit
PB: predicated region body
PF: predicated region fallthrough
CT: control target
= control target key end

     0   :  { %14 = vsyncpa [#allocation3], 0  ;;  %s1009_s0 = inlined_call_operand.vmem [shape: f32[16,259], index: 0, kind: input, shape index: {}]   ;;  %s1010_s1 = inlined_call_operand.hbm [shape: bf16[259,128], index: 1, kind: input, shape index: {}]   ;;  %s1011_s2 = inlined_call_operand.vmem [shape: f32[1,128], index: 2, kind: input, shape index: {}]   ;;  %s1012_s3 = inlined_call_operand.vmem [shape: bf16[128,128], index: 3, kind: input, shape index: {}]   ;;  %s1013_s4 = inlined_call_operand.vmem [shape: f32[1,128], index: 4, kind: input, shape index: {}]   ;;  %s1014_s5 = inlined_call_operand.vmem [shape: bf16[128,64], index: 5, kind: input, shape index: {}]   ;;  %s1015_s6 = inlined_call_operand.vmem [shape: f32[1,64], index: 6, kind: input, shape index: {}]   ;;  %s1016_s7 = inlined_call_operand.vmem [shape: bf16[2,64], index: 7, kind: input, shape index: {}]   ;;  %s1017_s8 = inlined_call_operand.vmem [shape: f32[2,1], index: 8, kind: input, shape index: {}]   ;;  %s1018_s9 = inlined_call_operand.hbm [shape: f32[2,16], index: 9, kind: output, shape index: {}]  }
   0x1   :  { %15 = vsyncpa [#allocation4], 0  ;;  %s820_s30 = smov [#allocation2]   ;;  %s772_s13 = scalar_lea.hbm %s1010_s1, 2112 }
   0x2   :  { %s23_s10 = sshll.u32 %s820_s30, 4  ;;  %p773_p0 = scmp.ne.s32.totalorder %s1010_s1, %s772_s13  ;;  %s24_s10 = int_to_ptr.vmem [resolvable:$true] %s23_s10 }
   0x3   :  { %p776_p1 = scmp.lt.u32.totalorder %s772_s13, %s1010_s1 }
   0x5   :  { %p778_p2 = pnand %p776_p1, %p773_p0 }
   0x7   :  { %781 = shalt.err (!%p778_p2)
}
   0x8   :  { %s782_s18 = scalar_lea.vmem %s24_s10, 2112  ;;  %p787_p4 = scmp.lt.s32.totalorder %s24_s10, %s24_s10 }
   0x9   :  { %p783_p3 = scmp.ne.s32.totalorder %s24_s10, %s782_s18  ;;  %p788_p5 = scmp.lt.s32.totalorder %s782_s18, %s782_s18 }
   0xb   :  { %p789_p6 = por %p788_p5, %p787_p4 }
   0xd   :  { %p790_p7 = pnand %p789_p6, %p783_p3 }
   0xf   :  { %793 = shalt.err (!%p790_p7)
}
  0x10   :  { %s821_s19 = smov 64   ;;  %s822_s20 = smov 4  }
  0x11   :  { %29 = dma.hbm_to_vmem [thread:$0]  %s1010_s1, 2112, %s24_s10, [#allocation3], %s821_s19, %s821_s19, %s822_s20  }
  0x12   :  { %816 = dma.done.wait [#allocation3], 2112  }
  0x13   :  { %817 = vsyncadd [#allocation3], 4294965184  ;;  %v823_v0 = vmov 0.0   ;;  %vm824_vm0 = vmmov 0   ;;  %v737_v1 = vld [vmem:[#allocation2 + $0x40] sm:$0xff]   ;;  %v739_v3 = vld [vmem:[#allocation2 + $0x48] sm:$0xff]  }
  0x14   :  { %676 = vmatprep.subr.bf16.mxu1 %v823_v0  ;;  %678 = vmatprep.mubr.msk.bf16.mxu1 %vm824_vm0, %v823_v0  ;;  %v738_v2 = vld [vmem:[#allocation2] sm:$0xff]   ;;  %v740_v4 = vld [vmem:[#allocation2 + $0x8] sm:$0xff]   ;;  %v741_v5 = vld [vmem:[#allocation2 + $0x50] sm:$0xff]   ;;  %vm200_vm1 = vcmask 1040384   ;;  %vm201_vm2 = vcmask 1041408   ;;  %v825_v10 = vmov 65535  }
  0x15   :  { %632 = vmatprep.subr.bf16.mxu0 %v737_v1  ;;  %v742_v6 = vld [vmem:[#allocation2 + $0x10] sm:$0xff]   ;;  %v743_v7 = vld [vmem:[#allocation2 + $0x58] sm:$0xff]   ;;  %v745_v9 = vld [vmem:[#allocation2 + $0x60] sm:$0xff]   ;;  %v202_v11 = vsel %vm200_vm1, 4294967295, %v825_v10  ;;  %vm196_vm3 = vcmask 23552   ;;  %vm529_vm4 = vcmask 523264  }
  0x16   :  { %633 = vmatpush3.bf16.msra.mxu0 %v738_v2  ;;  %v744_v8 = vld [vmem:[#allocation2 + $0x18] sm:$0xff]   ;;  %v746_v12 = vld [vmem:[#allocation2 + $0x20] sm:$0xff]   ;;  %v747_v13 = vld [vmem:[#allocation2 + $0x68] sm:$0xff]   ;;  %v203_v16 = vsel %vm201_vm2, %v202_v11, 0  ;;  %vm577_vm5 = vcmask 123904  }
  0x17   :  { %634 = vmatprep.subr.bf16.mxu0 %v739_v3  ;;  %v49_v14 = vld [vmem:[%s1009_s0 + $0x8] sm:$0xff]  ;;  %v52_v15 = vld [vmem:[%s1009_s0 + $0x20] sm:$0xff]  ;;  %v50_v19 = vld [vmem:[%s1009_s0 + $0x10] sm:$0xff] }
  0x18   :  { %v55_v17 = vpack.c.bf16 %v52_v15, %v49_v14  ;;  %v753_v18 = vld [vmem:[#allocation2 + $0x80] ss:$0 sps:$4 sm:$0x33]   ;;  %v53_v20 = vld [vmem:[%s1009_s0 + $0x28] sm:$0xff]  ;;  %v749_v23 = vld [vmem:[#allocation2 + $0x70] sm:$0xff]  }
  0x19   :  { %v748_v21 = vld [vmem:[#allocation2 + $0x28] sm:$0xff]   ;;  %v205_v22 = vand.u32 %v753_v18, %v203_v16  ;;  %v56_v24 = vpack.c.bf16 %v53_v20, %v50_v19  ;;  %v750_v25 = vld [vmem:[#allocation2 + $0x30] sm:$0xff]   ;;  %v754_v26 = vld [vmem:[%s1012_s3] sm:$0xff]  }
  0x1a   :  { %635 = vmatpush3.bf16.msra.mxu0 %v740_v4  ;;  %239 = vmatprep.mubr.bf16.mxu0 %v55_v17  ;;  %v751_v27 = vld [vmem:[#allocation2 + $0x78] sm:$0xff]   ;;  %v755_v28 = vld [vmem:[%s1012_s3 + $0x8] sm:$0xff]   ;;  %v48_v30 = vld [vmem:[%s1009_s0] sm:$0xff] }
  0x1b   :  { %636 = vmatprep.subr.bf16.mxu0 %v741_v5  ;;  %677 = vmatpush3.bf16.msra.mxu1 %v205_v22  ;;  %v752_v29 = vld [vmem:[#allocation2 + $0x38] sm:$0xff]   ;;  %v756_v32 = vld [vmem:[%s1012_s3 + $0x10] sm:$0xff]   ;;  %v758_v35 = vld [vmem:[%s1012_s3 + $0x20] sm:$0xff]  }
  0x1c   :  { %682 = vmatprep.subr.bf16.mxu1 %v823_v0  ;;  %v51_v31 = vld [vmem:[%s1009_s0 + $0x18] sm:$0xff]  ;;  %v759_v36 = vld [vmem:[%s1012_s3 + $0x28] sm:$0xff]   ;;  %v760_v37 = vld [vmem:[%s1012_s3 + $0x30] sm:$0xff]  }
  0x1d   :  { %v54_v33 = vpack.c.bf16 %v51_v31, %v48_v30  ;;  %v757_v34 = vld [vmem:[%s1012_s3 + $0x18] sm:$0xff]   ;;  %v762_v39 = vld [vmem:[%s1014_s5] sm:$0xff]   ;;  %v763_v40 = vld [vmem:[%s1014_s5 + $0x8] sm:$0xff]  }
  0x1e   :  { %637 = vmatpush3.bf16.msra.mxu0 %v742_v6  ;;  %679 = vmatmul.mubr.msk.bf16.vlgmr.msra.gmra.mrb[0].mxu1 %vm196_vm3, %v56_v24  ;;  %v761_v38 = vld [vmem:[%s1012_s3 + $0x38] sm:$0xff]   ;;  %v764_v41 = vld [vmem:[%s1014_s5 + $0x10] sm:$0xff]   ;;  %v766_v43 = vld [vmem:[%s1014_s5 + $0x20] sm:$0xff]  }
  0x1f   :  { %638 = vmatprep.subr.bf16.mxu0 %v743_v7  ;;  %683 = vmatpush3.bf16.msra.mxu1 %v754_v26  ;;  %v765_v42 = vld [vmem:[%s1014_s5 + $0x18] sm:$0xff]   ;;  %v767_v44 = vld [vmem:[%s1014_s5 + $0x28] sm:$0xff]   ;;  %v594_v51 = vld [vmem:[%s1011_s2] ss:$0 sm:$0xff] }
  0x20   :  { %698 = vmatprep.mubr.msk.bf16.mxu1 %vm824_vm0, %v823_v0  ;;  %684 = vmatprep.subr.bf16.mxu1 %v823_v0  ;;  %v768_v63 = vld [vmem:[%s1014_s5 + $0x30] sm:$0xff]   ;;  %v769_v1 = vld [vmem:[%s1014_s5 + $0x38] sm:$0xff]   ;;  %v613_v2 = vld [vmem:[%s1013_s4] ss:$0 sm:$0xff] }
  0x21   :  { %v521_v24 = vld [vmem:[%s1016_s7] sm:$0x1] }
  0x22   :  { %639 = vmatpush3.bf16.msra.mxu0 %v744_v8 }
  0x23   :  { %640 = vmatprep.subr.bf16.mxu0 %v745_v9  ;;  %685 = vmatpush3.bf16.msra.mxu1 %v755_v28 }
  0x24   :  { %686 = vmatprep.subr.bf16.mxu1 %v823_v0 }
  0x26   :  { %641 = vmatpush3.bf16.msra.mxu0 %v746_v12  ;;  %v826_v12 = vmov 0  }
  0x27   :  { %642 = vmatprep.subr.bf16.mxu0 %v747_v13  ;;  %687 = vmatpush3.bf16.msra.mxu1 %v756_v32  ;;  %v622_v13 = vld [vmem:[%s1015_s6] ss:$0 sm:$0xff]  ;;  %s827_s6 = smov [#allocation5]  }
  0x28   :  { %688 = vmatprep.subr.bf16.mxu1 %v823_v0  ;;  %736 = vset.pattern.permute.xlu0 %v826_v12  ;;  %s585_s25 = sshll.u32 %s827_s6, 4  ;;  %s586_s25 = int_to_ptr.vmem [resolvable:$true] %s585_s25 }
  0x29   :  { %s794_s26 = scalar_lea.vmem %s586_s25, 32  ;;  %p799_p9 = scmp.lt.s32.totalorder %s586_s25, %s586_s25 }
  0x2a   :  { %643 = vmatpush3.bf16.msra.mxu0 %v748_v21  ;;  %p795_p8 = scmp.ne.s32.totalorder %s586_s25, %s794_s26  ;;  %p800_p10 = scmp.lt.s32.totalorder %s794_s26, %s794_s26 }
  0x2b   :  { %644 = vmatprep.subr.bf16.mxu0 %v749_v23  ;;  %689 = vmatpush3.bf16.msra.mxu1 %v757_v34 }
  0x2c   :  { %690 = vmatprep.subr.bf16.mxu1 %v823_v0  ;;  %p801_p11 = por %p800_p10, %p799_p9 }
  0x2e   :  { %645 = vmatpush3.bf16.msra.mxu0 %v750_v25  ;;  %p802_p12 = pnand %p801_p11, %p795_p8 }
  0x2f   :  { %646 = vmatprep.subr.bf16.mxu0 %v751_v27  ;;  %691 = vmatpush3.bf16.msra.mxu1 %v758_v35 }
  0x30   :  { %692 = vmatprep.subr.bf16.mxu1 %v823_v0 }
  0x32   :  { %647 = vmatpush3.bf16.msra.mxu0 %v752_v29 }
  0x33   :  { %702 = vmatprep.subr.bf16.mxu0 %v823_v0  ;;  %693 = vmatpush3.bf16.msra.mxu1 %v759_v36 }
  0x34   :  { %694 = vmatprep.subr.bf16.mxu1 %v823_v0 }
  0x35   :  { %240 = vmatmul.mubr.bf16.vlgmr.msra.gmra.mrb[0].mxu0 %v54_v33 }
  0x36   :  { %718 = vmatprep.mubr.msk.bf16.mxu0 %vm824_vm0, %v823_v0  ;;  %703 = vmatpush3.bf16.msra.mxu0 %v762_v39 }
  0x37   :  { %695 = vmatpush3.bf16.msra.mxu1 %v760_v37  ;;  %704 = vmatprep.subr.bf16.mxu0 %v823_v0 }
  0x38   :  { %696 = vmatprep.subr.bf16.mxu1 %v823_v0 }
  0x3a   :  { %705 = vmatpush3.bf16.msra.mxu0 %v763_v40 }
  0x3b   :  { %697 = vmatpush3.bf16.msra.mxu1 %v761_v38  ;;  %706 = vmatprep.subr.bf16.mxu0 %v823_v0 }
  0x3c   :  { %722 = vmatprep.subr.bf16.mxu1 %v823_v0 }
  0x3e   :  { %707 = vmatpush3.bf16.msra.mxu0 %v764_v41 }
  0x3f   :  { %708 = vmatprep.subr.bf16.mxu0 %v823_v0 }
  0x42   :  { %709 = vmatpush3.bf16.msra.mxu0 %v765_v42 }
  0x43   :  { %710 = vmatprep.subr.bf16.mxu0 %v823_v0 }
  0x46   :  { %711 = vmatpush3.bf16.msra.mxu0 %v766_v43 }
  0x47   :  { %712 = vmatprep.subr.bf16.mxu0 %v823_v0 }
  0x4a   :  { %713 = vmatpush3.bf16.msra.mxu0 %v767_v44 }
  0x4b   :  { %714 = vmatprep.subr.bf16.mxu0 %v823_v0 }
  0x4e   :  { %715 = vmatpush3.bf16.msra.mxu0 %v768_v63 }
  0x4f   :  { %716 = vmatprep.subr.bf16.mxu0 %v823_v0 }
  0x52   :  { %717 = vmatpush3.bf16.msra.mxu0 %v769_v1 }
  0xf1   :  { %v282_v45 = vpop.f32.mrb[0].mxu1 }
  0xf2   :  { %v680_v46 = vpop.f32.mrb[1].mxu1 }
  0xf3   :  { %v285_v47 = vpop.f32.mrb[2].mxu1 }
  0xf4   :  { %v681_v48 = vpop.f32.mrb[3].mxu1 }
 0x108   :  { %v648_v49 = vpop.f32.mrb[0].mxu0 }
 0x109   :  { %v649_v50 = vpop.f32.mrb[1].mxu0 }
 0x10a   :  { %v650_v52 = vadd.f32 %v649_v50, %v648_v49  ;;  %v651_v53 = vpop.f32.mrb[2].mxu0 }
 0x10b   :  { %v652_v54 = vpop.f32.mrb[3].mxu0 }
 0x10c   :  { %v242_v55 = vadd.f32 %v650_v52, %v594_v51  ;;  %v653_v56 = vadd.f32 %v652_v54, %v651_v53 }
 0x10e   :  { %v283_v57 = vadd.f32 %v282_v45, %v242_v55  ;;  %v245_v58 = vadd.f32 %v653_v56, %v594_v51 }
 0x110   :  { %v286_v59 = vadd.f32 %v285_v47, %v245_v58  ;;  %v289_v60 = vmax.f32 %v283_v57, 0.0 }
 0x112   :  { %v290_v61 = vmax.f32 %v286_v59, 0.0 }
 0x114   :  { %v291_v62 = vpack.c.bf16 %v290_v61, %v289_v60 }
 0x116   :  { %699 = vmatmul.mubr.bf16.vlgmr.msra.gmra.mrb[4].mxu1 %v291_v62 }
 0x117   :  { %724 = vmatprep.mubr.msk.bf16.mxu1 %vm824_vm0, %v823_v0  ;;  %v523_v0 = vld [vmem:[%s1017_s8] sm:$0x3] }
 0x118   :  { %526 = vperm.xlu0 %736, %v523_v0  }
 0x197   :  { %v527_v25 = vpop.permute.xlu0 %526 }
 0x1e9   :  { %v397_v3 = vpop.f32.mrb[4].mxu1 }
 0x1ea   :  { %v398_v4 = vadd.f32 %v613_v2, %v397_v3  ;;  %v700_v5 = vpop.f32.mrb[5].mxu1 }
 0x1eb   :  { %v400_v6 = vpop.f32.mrb[6].mxu1 }
 0x1ec   :  { %v401_v7 = vadd.f32 %v613_v2, %v400_v6  ;;  %v701_v8 = vpop.f32.mrb[7].mxu1  ;;  %v404_v9 = vmax.f32 %v398_v4, 0.0 }
 0x1ee   :  { %v405_v10 = vmax.f32 %v401_v7, 0.0 }
 0x1f0   :  { %v406_v11 = vpack.c.bf16 %v405_v10, %v404_v9 }
 0x1f2   :  { %719 = vmatmul.mubr.bf16.vlgmr.msra.gmra.mrb[4].mxu0 %v406_v11 }
 0x2c5   :  { %v512_v14 = vpop.f32.mrb[4].mxu0 }
 0x2c6   :  { %v513_v15 = vadd.f32 %v622_v13, %v512_v14  ;;  %v720_v16 = vpop.f32.mrb[5].mxu0 }
 0x2c7   :  { %v515_v17 = vpop.f32.mrb[6].mxu0 }
 0x2c8   :  { %v516_v18 = vadd.f32 %v622_v13, %v515_v17  ;;  %v721_v19 = vpop.f32.mrb[7].mxu0  ;;  %v519_v20 = vmax.f32 %v513_v15, 0.0 }
 0x2ca   :  { %v520_v21 = vmax.f32 %v516_v18, 0.0 }
 0x2cc   :  { %v522_v22 = vpack.c.bf16 %v520_v21, %v519_v20 }
 0x2ce   :  { %v534_v23 = vsel %vm529_vm4, %v522_v22, 0 }
 0x2cf   :  { %723 = vmatpush3.bf16.xpose.msra.mxu1 %v534_v23 }
 0x2d6   :  { %725 = vmatmul.mubr.msk.bf16.vlgmr.msra.gmra.mrb[8].mxu1 %vm529_vm4, %v521_v24 }
 0x3a9   :  { %v570_v26 = vpop.f32.mrb[8].mxu1 }
 0x3aa   :  { %v571_v27 = vadd.f32 %v570_v26, %v527_v25  ;;  %v726_v28 = vpop.f32.mrb[9].mxu1 }
 0x3ab   :  { %v573_v29 = vpop.f32.mrb[10].mxu1 }
 0x3ac   :  { %770 = vtanh.f32 %v571_v27  ;;  %v727_v30 = vpop.f32.mrb[11].mxu1 }
 0x3b6   :  { %v771_v31 = vpop.eup %770 }
 0x3b7   :  { %578 = vst.msk [vmem:[#allocation5] sm:$0x3] %vm577_vm5, %v771_v31 }
 0x3b8   :  { %805 = shalt.err (!%p802_p12)
}
 0x3b9   :  { %s806_s28 = scalar_lea.hbm %s1018_s9, 32 }
 0x3ba   :  { %p807_p13 = scmp.ne.s32.totalorder %s1018_s9, %s806_s28  ;;  %p810_p0 = scmp.lt.u32.totalorder %s806_s28, %s1018_s9 }
 0x3bc   :  { %p812_p1 = pnand %p810_p0, %p807_p13 }
 0x3be   :  { %815 = shalt.err (!%p812_p1)
}
 0x3bf   :  { %588 = dma.vmem_to_hbm [thread:$0]  %s586_s25, 32, %s1018_s9, [#allocation4]  }
 0x3c0   :  { %818 = dma.done.wait [#allocation4], 32  }
 0x3c1   :  { %819 = vsyncadd [#allocation4], 4294967264 }
 0x3c2   :  { %592 = vsyncpa [#allocation3], 1 }
 0x3c3   :  { %593 = vsyncpa [#allocation4], 1 }

</bundles_post_ra>
